<compile_context>
chip_gen: v7x
topology: tpu7x:2x2x1
jax: 0.10.0
libtpu: 0.0.40
codegen_flags: <defaults>
</compile_context>

<pallas_src>
import functools

import jax
import jax.numpy as jnp
from jax.experimental import pallas as pl
from jax.experimental.pallas import tpu as pltpu

VARIANCE = (0.1, 0.2)  # train_cfg['variance'] is not given upstream; standard SSD values.


# ------------------------- plain-JAX glue: box matching ----------------------
# TODO(synk): the repo's box_utils.match consumes variable-length GT lists; this
# fixed-T plain-JAX re-implementation should mask padded/degenerate GT boxes
# before matching (jnp.log of zero-area boxes would poison loc_t).

def _point_form(priors):  # (cx, cy, w, h) -> (xmin, ymin, xmax, ymax)
    return jnp.concatenate([priors[:, :2] - priors[:, 2:] / 2.0,
                            priors[:, :2] + priors[:, 2:] / 2.0], axis=1)


def _jaccard(box_a, box_b):
    lt = jnp.maximum(box_a[:, None, :2], box_b[None, :, :2])
    rb = jnp.minimum(box_a[:, None, 2:], box_b[None, :, 2:])
    wh = jnp.maximum(rb - lt, 0.0)
    inter = wh[..., 0] * wh[..., 1]
    area_a = ((box_a[:, 2] - box_a[:, 0]) * (box_a[:, 3] - box_a[:, 1]))[:, None]
    area_b = ((box_b[:, 2] - box_b[:, 0]) * (box_b[:, 3] - box_b[:, 1]))[None, :]
    return inter / (area_a + area_b - inter)


def _encode(matched, priors, variances):
    g_cxcy = (matched[:, :2] + matched[:, 2:]) / 2.0 - priors[:, :2]
    g_cxcy = g_cxcy / (variances[0] * priors[:, 2:])
    g_wh = (matched[:, 2:] - matched[:, :2]) / priors[:, 2:]
    g_wh = jnp.log(g_wh) / variances[1]
    return jnp.concatenate([g_cxcy, g_wh], axis=1)


def _match_one(truths, labels, priors, threshold):
    overlaps = _jaccard(truths, _point_form(priors))          # [T, P]
    t = truths.shape[0]
    best_prior_idx = jnp.argmax(overlaps, axis=1)             # [T]
    best_truth_overlap = jnp.max(overlaps, axis=0)            # [P]
    best_truth_idx = jnp.argmax(overlaps, axis=0)             # [P]
    best_truth_overlap = best_truth_overlap.at[best_prior_idx].set(2.0)
    best_truth_idx = best_truth_idx.at[best_prior_idx].set(jnp.arange(t))
    matched = truths[best_truth_idx]                          # [P, 4]
    conf = labels[best_truth_idx].astype(jnp.int32) + 1
    conf = jnp.where(best_truth_overlap < threshold, 0, conf)
    loc = _encode(matched, priors, VARIANCE)
    return loc, conf


# -------------------- kernel A: per-prior pass (gridded, lane-dense) ---------
# Blocks (per (b, j)): locs [1, 8, TM] bf16 (rows 0-3 loc_p, rows 4-7 loc_t),
# conf [1, C, TM] bf16, conf_t [1, 1, TM] int32.  Single packed output block
# [1, 4, TM] f32: {neg-masked CE, pos CE, pos smooth-L1, pos mask}.

def _perprior_kernel(locs_ref, conf_ref, conf_t_ref, rows_ref, *, m_valid):
    conf_t = conf_t_ref[0]                                    # [1, TM] int32
    pos = conf_t > 0
    posf = pos.astype(jnp.float32)

    # localization: smooth-L1 over the 4 coords (sublane axis), positives only
    locs = locs_ref[0].astype(jnp.float32)                    # [8, TM]
    d = locs[0:4, :] - locs[4:8, :]
    ad = jnp.abs(d)
    sl1 = jnp.where(ad < 1.0, 0.5 * d * d, ad - 0.5)
    sl1_pos = jnp.sum(sl1, axis=0, keepdims=True) * posf      # [1, TM]

    # classification CE: logsumexp over classes (sublane axis) minus gt logit
    conf = conf_ref[0].astype(jnp.float32)                    # [C, TM]
    mx = jnp.max(conf, axis=0, keepdims=True)
    lse = jnp.log(jnp.sum(jnp.exp(conf - mx), axis=0, keepdims=True)) + mx
    cls = jax.lax.broadcasted_iota(jnp.int32, conf.shape, 0)
    gathered = jnp.sum(jnp.where(cls == conf_t, conf, 0.0), axis=0, keepdims=True)
    ce = lse - gathered                                       # [1, TM]

    # valid = real (un-padded) prior columns; padded columns never mined
    tm = conf.shape[1]
    gidx = pl.program_id(1) * tm + jax.lax.broadcasted_iota(jnp.int32, (1, tm), 1)
    negf = jnp.logical_and(gidx < m_valid, jnp.logical_not(pos)).astype(jnp.float32)

    neg_ce = jnp.maximum(ce, 0.0) * negf                      # mining input, >= 0
    pos_ce = ce * posf
    rows_ref[0] = jnp.concatenate([neg_ce, pos_ce, sl1_pos, posf], axis=0)


# -------- kernel B: per-image hard-negative mining + partial reductions ------
# Gridded over the batch ("parallel" -> both TensorCores on v7x).  Only the SUM
# of the top-k masked-CE values feeds the loss (tie-order invariant), so the
# k-th largest value is found exactly with an 8-way search over the int32 bit
# patterns of the non-negative CE values (float order == bit order).  12 passes
# suffice: the interval shrinks >= 8x per pass from 2^31.

_SEARCH_PASSES = 12


def _mine_kernel(rows_ref, out_ref, *, negpos_ratio, m_valid):
    rows = rows_ref[0]                                        # [4, Mp] f32
    neg_ce = rows[0:1, :]                                     # [1, Mp] (>= 0, masked)
    pos_ce = rows[1:2, :]
    sl1 = rows[2:3, :]
    posf = rows[3:4, :]

    sl1_sum = jnp.sum(sl1, axis=1, keepdims=True)             # [1, 1]
    pos_ce_sum = jnp.sum(pos_ce, axis=1, keepdims=True)       # [1, 1]
    npos_f = jnp.sum(posf, axis=1, keepdims=True)             # [1, 1]
    npos_i = npos_f.astype(jnp.int32)
    k = jnp.minimum(negpos_ratio * npos_i, m_valid - 1)       # [1, 1] int32

    bits = jnp.maximum(pltpu.bitcast(neg_ce, jnp.int32), 0)   # [1, Mp]
    i1 = jax.lax.broadcasted_iota(jnp.int32, (8, 1), 0) + 1   # [8, 1] = 1..8

    lo = jnp.zeros((1, 1), jnp.int32)
    hi = jnp.full((1, 1), 0x7F7FFFFF, jnp.int32)              # max finite f32 bits
    for _ in range(_SEARCH_PASSES):
        d = hi - lo
        # probes = lo + ceil(d*i/8), i=1..8 (split to avoid int32 overflow)
        probes = lo + (d // 8) * i1 + ((d % 8) * i1 + 7) // 8  # [8, 1]
        cnt = jnp.sum((bits >= probes).astype(jnp.int32), axis=1, keepdims=True)
        feas = cnt >= k                                        # [8, 1]
        lo = jnp.max(jnp.where(feas, probes, lo), axis=0, keepdims=True)
        hi = jnp.min(jnp.where(feas, hi, probes - 1), axis=0, keepdims=True)

    thr_bits = lo                                              # k-th largest bits
    thr_val = pltpu.bitcast(thr_bits, jnp.float32)             # [1, 1]
    gt = bits > thr_bits                                       # strictly above k-th
    cnt_gt = jnp.sum(gt.astype(jnp.float32), axis=1, keepdims=True)
    sum_gt = jnp.sum(jnp.where(gt, neg_ce, 0.0), axis=1, keepdims=True)
    topk = sum_gt + thr_val * (k.astype(jnp.float32) - cnt_gt)  # [1, 1]

    lane = jax.lax.broadcasted_iota(jnp.int32, (1, 128), 1)
    out = (jnp.where(lane == 0, sl1_sum, 0.0)
           + jnp.where(lane == 1, pos_ce_sum, 0.0)
           + jnp.where(lane == 2, npos_f, 0.0)
           + jnp.where(lane == 3, topk, 0.0))
    out_ref[0] = out


# ---------------------- kernel C: tiled dice accumulator ---------------------

def _dice_kernel(sp_ref, sg_ref, acc_ref):
    @pl.when(pl.program_id(0) == 0)
    def _():
        acc_ref[...] = jnp.zeros_like(acc_ref)
    sp = sp_ref[...]
    sg = sg_ref[...]
    inter = jnp.sum(sp * sg, axis=0, keepdims=True)            # [1, 128]
    union = jnp.sum(sp + sg, axis=0, keepdims=True)            # [1, 128]
    acc_ref[...] += jnp.concatenate([inter, union], axis=0)


# ------------------------------ wrapper ---------------------------------------

def _pick_tile(m):
    # biggest tile whose padding waste stays <= ~1/4 tile
    for tm in (1024, 512, 256):
        if m >= 4 * tm:
            return tm
    return 128


def multibox_loss(predictions, targets, segs, *, num_classes, overlap_thresh, negpos_ratio):
    loc_data, conf_data, priors, seg_data = predictions
    target_boxes, target_labels = targets            # [B, Q, T, 4], [B, Q, T]
    B, P, Q, _ = loc_data.shape
    C = num_classes
    M = P * Q
    priors = priors[:P]

    # match() glue (plain JAX) -> loc_t [B, M, 4] f32, conf_t [B, M] int32
    match_fn = lambda t, l: _match_one(t, l, priors, overlap_thresh)
    loc_t, conf_t = jax.vmap(jax.vmap(match_fn))(target_boxes, target_labels)
    loc_t = jnp.transpose(loc_t, (0, 2, 1, 3)).reshape(B, M, 4)
    conf_t = jnp.transpose(conf_t, (0, 2, 1)).reshape(B, M).astype(jnp.int32)

    # lane-dense bf16 layouts: priors on the lane axis, coords/classes on sublanes
    loc_p8 = jnp.concatenate(
        [jnp.transpose(loc_data.astype(jnp.bfloat16).reshape(B, M, 4), (0, 2, 1)),
         jnp.transpose(loc_t.astype(jnp.bfloat16), (0, 2, 1))],
        axis=1)                                                               # [B, 8, M]
    conf = jnp.transpose(conf_data.astype(jnp.bfloat16).reshape(B, M, C), (0, 2, 1))  # [B, C, M]

    # pad the prior axis to a full multiple of the tile (not just 128)
    TM = _pick_tile(M)
    Mp = ((M + TM - 1) // TM) * TM
    pad = Mp - M
    if pad:
        loc_p8 = jnp.pad(loc_p8, ((0, 0), (0, 0), (0, pad)))
        conf = jnp.pad(conf, ((0, 0), (0, 0), (0, pad)))
        conf_t = jnp.pad(conf_t, ((0, 0), (0, pad)))
    conf_t3 = conf_t.reshape(B, 1, Mp)

    rows = pl.pallas_call(
        functools.partial(_perprior_kernel, m_valid=M),
        out_shape=jax.ShapeDtypeStruct((B, 4, Mp), jnp.float32),
        grid=(B, Mp // TM),
        in_specs=[
            pl.BlockSpec((1, 8, TM), lambda b, j: (b, 0, j)),
            pl.BlockSpec((1, C, TM), lambda b, j: (b, 0, j)),
            pl.BlockSpec((1, 1, TM), lambda b, j: (b, 0, j)),
        ],
        out_specs=pl.BlockSpec((1, 4, TM), lambda b, j: (b, 0, j)),
        compiler_params=pltpu.CompilerParams(
            dimension_semantics=("parallel", "parallel"),
            vmem_limit_bytes=48 * 1024 * 1024),
    )(loc_p8, conf, conf_t3)

    # per-image mining + partial reductions (one image per grid step)
    partials = pl.pallas_call(
        functools.partial(_mine_kernel, negpos_ratio=negpos_ratio, m_valid=M),
        out_shape=jax.ShapeDtypeStruct((B, 1, 128), jnp.float32),
        grid=(B,),
        in_specs=[pl.BlockSpec((1, 4, Mp), lambda b: (b, 0, 0))],
        out_specs=pl.BlockSpec((1, 1, 128), lambda b: (b, 0, 0)),
        compiler_params=pltpu.CompilerParams(
            dimension_semantics=("parallel",),
            vmem_limit_bytes=48 * 1024 * 1024),
    )(rows)

    p = partials[:, 0, :]                                      # [B, 128] (tiny)
    n_total = jnp.sum(p[:, 2])
    # NOTE: PyTorch parity — divides by N (inf/NaN if a batch has zero positives).
    loss_l = jnp.sum(p[:, 0]) / n_total
    loss_c = (jnp.sum(p[:, 1]) + jnp.sum(p[:, 3])) / n_total

    # dice-style segmentation loss, tiled accumulator (zero padding is dice-neutral)
    seg_p = seg_data.reshape(-1).astype(jnp.float32)
    seg_g = segs.reshape(-1).astype(jnp.float32)
    assert seg_p.shape[0] == seg_g.shape[0]
    n = seg_p.shape[0]
    TR = 256 if n >= 256 * 128 else 8
    chunk = TR * 128
    n_pad = ((n + chunk - 1) // chunk) * chunk - n
    if n_pad:
        seg_p = jnp.pad(seg_p, (0, n_pad))
        seg_g = jnp.pad(seg_g, (0, n_pad))
    seg_p = seg_p.reshape(-1, 128)
    seg_g = seg_g.reshape(-1, 128)
    n_rows = seg_p.shape[0]

    acc = pl.pallas_call(
        _dice_kernel,
        out_shape=jax.ShapeDtypeStruct((2, 128), jnp.float32),
        grid=(n_rows // TR,),
        in_specs=[pl.BlockSpec((TR, 128), lambda i: (i, 0)),
                  pl.BlockSpec((TR, 128), lambda i: (i, 0))],
        out_specs=pl.BlockSpec((2, 128), lambda i: (0, 0)),
        compiler_params=pltpu.CompilerParams(
            dimension_semantics=("arbitrary",),
            vmem_limit_bytes=48 * 1024 * 1024),
    )(seg_p, seg_g)

    inter = jnp.sum(acc[0])
    union = jnp.sum(acc[1]) + 1e-5
    loss_s = 1.0 - 2.0 * inter / union
    return loss_l, loss_c, loss_s


if __name__ == "__main__":
    key = jax.random.PRNGKey(0)
    k1, k2, k3, k4, k5, k6, k7 = jax.random.split(key, 7)

    B, P, Q, C, T = 2, 32, 4, 8, 3          # batch, priors, quad-slots, classes, GT/slot
    Hs = Ws = 16                            # segmentation map size

    loc_data = 0.1 * jax.random.normal(k1, (B, P, Q, 4), jnp.float32)
    conf_data = jax.random.normal(k2, (B, P, Q, C), jnp.float32)

    # priors on an 8x4 grid, (cx, cy, w, h) in [0, 1]
    gx, gy = jnp.meshgrid((jnp.arange(8) + 0.5) / 8.0,
                          (jnp.arange(4) + 0.5) / 4.0, indexing="ij")
    priors = jnp.stack([gx.reshape(-1), gy.reshape(-1),
                        jnp.full((P,), 0.3), jnp.full((P,), 0.3)], axis=1).astype(jnp.float32)

    # synthetic ground truth: T boxes (xyxy) + labels per (image, quad-slot)
    cxy = 0.2 + 0.6 * jax.random.uniform(k3, (B, Q, T, 2), jnp.float32)
    wh = 0.1 + 0.2 * jax.random.uniform(k4, (B, Q, T, 2), jnp.float32)
    target_boxes = jnp.concatenate([cxy - wh / 2.0, cxy + wh / 2.0], axis=-1)
    target_labels = jax.random.randint(k5, (B, Q, T), 0, C - 1)

    seg_data = jax.random.uniform(k6, (B, 1, Hs, Ws), jnp.float32)
    segs = (jax.random.uniform(k7, (B, Hs, Ws)) > 0.5).astype(jnp.float32)

    loss_l, loss_c, loss_s = multibox_loss(
        (loc_data, conf_data, priors, seg_data),
        (target_boxes, target_labels),
        segs,
        num_classes=C, overlap_thresh=0.5, negpos_ratio=3)

    jax.block_until_ready((loss_l, loss_c, loss_s))
    print("KERNEL_OK")
</pallas_src>

<mosaic_0001>
module attributes {stable_mosaic.version = 11 : i64} {
  func.func @_perprior_kernel(%arg0: i32, %arg1: i32, %arg2: memref<1x8x128xbf16, #tpu.memory_space<vmem>>, %arg3: memref<1x8x128xbf16, #tpu.memory_space<vmem>>, %arg4: memref<1x1x128xi32, #tpu.memory_space<vmem>>, %arg5: memref<1x4x128xf32, #tpu.memory_space<vmem>>) attributes {dimension_semantics = [#tpu.dimension_semantics<parallel>, #tpu.dimension_semantics<parallel>], iteration_bounds = array<i64: 2, 1>, scalar_prefetch = 0 : i64, scratch_operands = 0 : i64, tpu.core_type = #tpu.core_type<tc>, window_params = [{transform_indices = @transform_0, window_bounds = array<i64: 1, 8, 128>}, {transform_indices = @transform_1, window_bounds = array<i64: 1, 8, 128>}, {transform_indices = @transform_2, window_bounds = array<i64: 1, 1, 128>}, {transform_indices = @transform_3, window_bounds = array<i64: 1, 4, 128>}]} {
    %c0 = arith.constant 0 : index
    %c0_0 = arith.constant 0 : index
    %c0_1 = arith.constant 0 : index
    %0 = vector.load %arg4[%c0, %c0_0, %c0_1] : memref<1x1x128xi32, #tpu.memory_space<vmem>>, vector<1x1x128xi32>
    %1 = vector.shape_cast %0 : vector<1x1x128xi32> to vector<1x128xi32>
    %c0_i32 = arith.constant 0 : i32
    %2 = vector.broadcast %c0_i32 : i32 to vector<1x128xi32>
    %3 = arith.cmpi sgt, %1, %2 : vector<1x128xi32>
    %4 = arith.extui %3 : vector<1x128xi1> to vector<1x128xi32>
    %5 = arith.sitofp %4 : vector<1x128xi32> to vector<1x128xf32>
    %c0_2 = arith.constant 0 : index
    %c0_3 = arith.constant 0 : index
    %c0_4 = arith.constant 0 : index
    %6 = vector.load %arg2[%c0_2, %c0_3, %c0_4] : memref<1x8x128xbf16, #tpu.memory_space<vmem>>, vector<1x8x128xbf16>
    %7 = vector.shape_cast %6 : vector<1x8x128xbf16> to vector<8x128xbf16>
    %8 = arith.extf %7 : vector<8x128xbf16> to vector<8x128xf32>
    %9 = vector.extract_strided_slice %8 {offsets = [0, 0], sizes = [4, 128], strides = [1, 1]} : vector<8x128xf32> to vector<4x128xf32>
    %10 = vector.extract_strided_slice %8 {offsets = [4, 0], sizes = [4, 128], strides = [1, 1]} : vector<8x128xf32> to vector<4x128xf32>
    %11 = arith.subf %9, %10 : vector<4x128xf32>
    %12 = math.absf %11 : vector<4x128xf32>
    %cst = arith.constant 1.000000e+00 : f32
    %13 = vector.broadcast %cst : f32 to vector<4x128xf32>
    %14 = arith.cmpf olt, %12, %13 : vector<4x128xf32>
    %cst_5 = arith.constant 5.000000e-01 : f32
    %15 = vector.broadcast %cst_5 : f32 to vector<4x128xf32>
    %16 = arith.mulf %15, %11 : vector<4x128xf32>
    %17 = arith.mulf %16, %11 : vector<4x128xf32>
    %cst_6 = arith.constant 5.000000e-01 : f32
    %18 = vector.broadcast %cst_6 : f32 to vector<4x128xf32>
    %19 = arith.subf %12, %18 : vector<4x128xf32>
    %20 = arith.select %14, %17, %19 : vector<4x128xi1>, vector<4x128xf32>
    %cst_7 = arith.constant dense<0.000000e+00> : vector<128xf32>
    %21 = vector.multi_reduction <add>, %20, %cst_7 [0] : vector<4x128xf32> to vector<128xf32>
    %22 = vector.shape_cast %21 : vector<128xf32> to vector<1x128xf32>
    %23 = arith.mulf %22, %5 : vector<1x128xf32>
    %c0_8 = arith.constant 0 : index
    %c0_9 = arith.constant 0 : index
    %c0_10 = arith.constant 0 : index
    %24 = vector.load %arg3[%c0_8, %c0_9, %c0_10] : memref<1x8x128xbf16, #tpu.memory_space<vmem>>, vector<1x8x128xbf16>
    %25 = vector.shape_cast %24 : vector<1x8x128xbf16> to vector<8x128xbf16>
    %26 = arith.extf %25 : vector<8x128xbf16> to vector<8x128xf32>
    %cst_11 = arith.constant dense<0xFF800000> : vector<128xf32>
    %27 = vector.multi_reduction <maximumf>, %26, %cst_11 [0] : vector<8x128xf32> to vector<128xf32>
    %28 = vector.shape_cast %27 : vector<128xf32> to vector<1x128xf32>
    %29 = vector.broadcast %28 : vector<1x128xf32> to vector<8x128xf32>
    %30 = arith.subf %26, %29 : vector<8x128xf32>
    %31 = math.exp %30 : vector<8x128xf32>
    %cst_12 = arith.constant dense<0.000000e+00> : vector<128xf32>
    %32 = vector.multi_reduction <add>, %31, %cst_12 [0] : vector<8x128xf32> to vector<128xf32>
    %33 = vector.shape_cast %32 : vector<128xf32> to vector<1x128xf32>
    %34 = math.log %33 : vector<1x128xf32>
    %35 = arith.addf %34, %28 : vector<1x128xf32>
    %36 = tpu.iota {dimensions = array<i32: 0>} : vector<8x128xi32>
    %37 = vector.broadcast %1 : vector<1x128xi32> to vector<8x128xi32>
    %38 = arith.cmpi eq, %36, %37 : vector<8x128xi32>
    %cst_13 = arith.constant 0.000000e+00 : f32
    %39 = vector.broadcast %cst_13 : f32 to vector<8x128xf32>
    %40 = arith.select %38, %26, %39 : vector<8x128xi1>, vector<8x128xf32>
    %cst_14 = arith.constant dense<0.000000e+00> : vector<128xf32>
    %41 = vector.multi_reduction <add>, %40, %cst_14 [0] : vector<8x128xf32> to vector<128xf32>
    %42 = vector.shape_cast %41 : vector<128xf32> to vector<1x128xf32>
    %43 = arith.subf %35, %42 : vector<1x128xf32>
    %c128_i32 = arith.constant 128 : i32
    %44 = arith.muli %arg1, %c128_i32 : i32
    %45 = tpu.iota {dimensions = array<i32: 1>} : vector<1x128xi32>
    %46 = vector.broadcast %44 : i32 to vector<1x128xi32>
    %47 = arith.addi %46, %45 : vector<1x128xi32>
    %c128_i32_15 = arith.constant 128 : i32
    %48 = vector.broadcast %c128_i32_15 : i32 to vector<1x128xi32>
    %49 = arith.cmpi slt, %47, %48 : vector<1x128xi32>
    %cst_16 = arith.constant dense<true> : vector<1x128xi1>
    %50 = arith.xori %3, %cst_16 : vector<1x128xi1>
    %51 = arith.andi %49, %50 : vector<1x128xi1>
    %52 = arith.extui %51 : vector<1x128xi1> to vector<1x128xi32>
    %53 = arith.sitofp %52 : vector<1x128xi32> to vector<1x128xf32>
    %cst_17 = arith.constant 0.000000e+00 : f32
    %54 = vector.broadcast %cst_17 : f32 to vector<1x128xf32>
    %55 = arith.maximumf %43, %54 : vector<1x128xf32>
    %56 = arith.mulf %55, %53 : vector<1x128xf32>
    %57 = arith.mulf %43, %5 : vector<1x128xf32>
    %58 = tpu.concatenate %56, %57, %23, %5 in 0 : vector<1x128xf32>, vector<1x128xf32>, vector<1x128xf32>, vector<1x128xf32> -> vector<4x128xf32>
    %c0_18 = arith.constant 0 : index
    %c0_19 = arith.constant 0 : index
    %c0_20 = arith.constant 0 : index
    %59 = vector.load %arg5[%c0_18, %c0_19, %c0_20] : memref<1x4x128xf32, #tpu.memory_space<vmem>>, vector<1x4x128xf32>
    %60 = vector.shape_cast %59 : vector<1x4x128xf32> to vector<4x128xf32>
    %61 = vector.shape_cast %58 : vector<4x128xf32> to vector<1x4x128xf32>
    tpu.vector_store %arg5[%c0_18, %c0_19, %c0_20], %61 {strides = array<i32>} : memref<1x4x128xf32, #tpu.memory_space<vmem>>, vector<1x4x128xf32>,
    return
  }
  func.func @transform_0(%arg0: i32, %arg1: i32) -> (i32, i32, i32) {
    %c0_i32 = arith.constant 0 : i32
    %c0_i32_0 = arith.constant 0 : i32
    return %arg0, %c0_i32, %arg1 : i32, i32, i32
  }
  func.func @transform_1(%arg0: i32, %arg1: i32) -> (i32, i32, i32) {
    %c0_i32 = arith.constant 0 : i32
    %c0_i32_0 = arith.constant 0 : i32
    return %arg0, %c0_i32, %arg1 : i32, i32, i32
  }
  func.func @transform_2(%arg0: i32, %arg1: i32) -> (i32, i32, i32) {
    %c0_i32 = arith.constant 0 : i32
    %c0_i32_0 = arith.constant 0 : i32
    return %arg0, %c0_i32, %arg1 : i32, i32, i32
  }
  func.func @transform_3(%arg0: i32, %arg1: i32) -> (i32, i32, i32) {
    %c0_i32 = arith.constant 0 : i32
    %c0_i32_0 = arith.constant 0 : i32
    return %arg0, %c0_i32, %arg1 : i32, i32, i32
  }
}

</mosaic_0001>

<bundles_post_ra>
// kernel: tpu_custom_call.1
= control target key start
LH: loop header
LB: loop body
LE: loop exit
PB: predicated region body
PF: predicated region fallthrough
CT: control target
= control target key end

     0   :  { %8 = vsyncpa [#allocation3], 0  ;;  %s986_s0 = inlined_call_operand.hbm [shape: bf16[2,8,128], index: 0, kind: input, shape index: {}]   ;;  %s987_s1 = inlined_call_operand.hbm [shape: bf16[2,8,128], index: 1, kind: input, shape index: {}]   ;;  %s988_s2 = inlined_call_operand.vmem [shape: s32[2,1,128], index: 2, kind: input, shape index: {}]   ;;  %s989_s3 = inlined_call_operand.hbm [shape: f32[2,4,128], index: 3, kind: output, shape index: {}]  }
   0x1   :  { %10 = vsyncpa [#allocation3 + $0x1], 0 }
   0x2   :  { %11 = vsyncpa [#allocation6], 0 }
   0x3   :  { %13 = vsyncpa [#allocation6 + $0x1], 0 }
   0x4   :  { %14 = vsyncpa [#allocation4], 0 }
   0x5   :  { %16 = vsyncpa [#allocation4 + $0x1], 0  ;;  %s756_s12 = smov 0   ;;  %s758_s13 = smov 0  }
   0x6   :  { %s760_s14 = smov 0   ;;  %s762_s15 = smov 0  }
   0x7   :  { %s764_s16 = smov 0   ;;  %s766_s17 = smov 0  }
   0x8 LB: > { %s491_s18 = sadd.s32 4294967295, %s729_s17   ;;  %s492_s19 = sadd.s32 4294967294, %s729_s17   ;;  %s729_s17 = sphi %s766_s17, %s22_s17   ;;  %s725_s16 = sphi %s764_s16, %s1009_s16   ;;  %s721_s15 = sphi %s762_s15, %s1008_s15   ;;  %s717_s14 = sphi %s760_s14, %s1007_s14   ;;  %s713_s13 = sphi %s758_s13, %s1006_s13   ;;  %s709_s12 = sphi %s756_s12, %s1005_s12  }
   0x9   : > { %s34_s20 = sadd.s32 1, %s725_s16  ;;  %s43_s21 = sadd.s32 1, %s717_s14 }
   0xa   : > { %p36_p0 = scmp.ge.s32.totalorder %s34_s20, 2  ;;  %p50_p1 = scmp.ne.s32.totalorder %s717_s14, %s713_s13 }
   0xb   : > { %p51_p2 = scmp.eq.s32.totalorder %s729_s17, 0  ;;  %p56_p3 = scmp.ne.s32.totalorder %s713_s13, %s709_s12 }
   0xc   : > { %s1011_s20 = smov (%p36_p0, %s34_s20), 0  ;;  %p57_p5 = scmp.eq.s32.totalorder %s491_s18, 0 }
   0xd   : > { %p797_p4 = por %p51_p2, %p50_p1  ;;  %s38_s23 = ssub.s32 %s725_s16, %s1011_s20 }
   0xe   : > { %p138_p6 = scmp.eq.s32.totalorder %s491_s18, 1  ;;  %p41_p7 = scmp.eq.s32.totalorder %s38_s23, 0 }
   0xf   : > { %p803_p8 = por %p57_p5, %p56_p3  ;;  %p144_p10 = scmp.eq.s32.totalorder %s492_s19, 1 }
  0x10   : > { %p807_p9 = por %p138_p6, %p50_p1  ;;  %p527_p13 = scmp.lt.s32.totalorder %s729_s17, 2 }
  0x11   : > { %s993_s24 = scalar_select %p803_p8, 1, 0 }
  0x12   : > { %s994_s25 = scalar_select %p807_p9, 1, 0 }
  0x13   : > { %s812_s26 = scalar_select %p41_p7, %s717_s14, %s43_s21  }
  0x14   : > { %p814_p11 = por %p144_p10, %p56_p3  ;;  %s821_s28 = sand.u32 1, %s717_s14  }
  0x15   : > { %s495_s29 = sshll.u32 %s821_s28, 2  ;;  %s496_s30 = sshll.u32 %s725_s16, 6 }
  0x16   : > { %s995_s27 = scalar_select %p814_p11, 1, 0 }
  0x17   : > { %s830_s6 = scalar_lea.hbm %s986_s0, %s496_s30  ;;  %s168_s7 = scalar_lea.vmem [#allocation2], %s495_s29 }
  0x18   : > { %s176_s8 = sshll.u32 %s168_s7, 4  ;;  %p838_p0 = pnand %p527_p13, %p797_p4  ;;  %s834_s8 = int_to_ptr.vmem [resolvable:$true] %s176_s8 }
  0x19   : > { %s165_s10 = scalar_lea.sflag [#allocation3], %s821_s28  ;;  %s583_s11 = scalar_lea.hbm %s830_s6, 64 }
  0x1a   : > { %p584_p3 = scmp.ne.s32.totalorder %s830_s6, %s583_s11  ;;  %p585_p5 = pneg %p838_p0 }
  0x1b   : > { %s588_s21 = scalar_lea.hbm %s986_s0, 128  ;;  %p589_p4 = scmp.lt.u32.totalorder %s830_s6, %s986_s0 }
  0x1c   : > { %p586_p6 = pnand %p585_p5, %p584_p3  ;;  %p590_p10 = scmp.lt.u32.totalorder %s588_s21, %s583_s11 }
  0x1d   : > { %p592_p12 = scmp.lt.u32.totalorder %s583_s11, %s830_s6 }
  0x1e   : > { %p587_p7 = pneg %p586_p6  ;;  %p591_p13 = por %p590_p10, %p589_p4 }
  0x20   : > { %p593_p1 = por %p592_p12, %p591_p13 }
  0x22   : > { %p594_p2 = pnand %p593_p1, %p587_p7 }
  0x24   : > { %597 = shalt.err (!%p594_p2)
}
  0x25   : > { %s598_s4 = scalar_lea.vmem %s834_s8, 64  ;;  %s731_s5 = smov [#allocation2]  }
  0x26   : > { %p599_p3 = scmp.ne.s32.totalorder %s834_s8, %s598_s4  ;;  %s603_s7 = sshll.u32 %s731_s5, 4  ;;  %s604_s7 = int_to_ptr.vmem [resolvable:$false] %s603_s7 }
  0x27   : > { %s605_s18 = scalar_lea.vmem %s604_s7, 128  ;;  %p606_p9 = scmp.lt.s32.totalorder %s834_s8, %s604_s7 }
  0x28   : > { %p601_p6 = pnand %p599_p3, %p585_p5  ;;  %p607_p4 = scmp.lt.s32.totalorder %s605_s18, %s598_s4 }
  0x2a   : > { %p602_p11 = pneg %p601_p6  ;;  %p608_p10 = por %p607_p4, %p606_p9 }
  0x2c   : > { %p609_p12 = pnand %p608_p10, %p602_p11 }
  0x2e   : > { %612 = shalt.err (!%p609_p12)
}
  0x2f   : > { %519 = dma.hbm_to_vmem [thread:$0]  (!%p838_p0), %s830_s6, 64, %s834_s8, %s165_s10  }
  0x30   : > { %p997_p1 = scmp.lt.s32.totalorder %s729_s17, 3  ;;  %p998_p2 = scmp.ge.s32.totalorder %s729_s17, 1 }
  0x31   : > { %s883_s22 = scalar_lea.hbm %s987_s1, %s496_s30  ;;  %s187_s23 = scalar_lea.vmem [#allocation5], %s495_s29 }
  0x32   : > { %p874_p7 = pnand %p998_p2, %p997_p1  ;;  %s195_s4 = sshll.u32 %s187_s23, 4  ;;  %s196_s4 = int_to_ptr.vmem [resolvable:$true] %s195_s4 }
  0x33   : > { %s184_s6 = scalar_lea.sflag [#allocation6], %s821_s28  ;;  %s613_s8 = scalar_lea.hbm %s883_s22, 64 }
  0x34   : > { %s999_s11 = scalar_select %p874_p7, 1, 0 }
  0x35   : > { %p614_p9 = scmp.ne.s32.totalorder %s883_s22, %s613_s8  ;;  %s618_s30 = scalar_lea.hbm %s987_s1, 128 }
  0x36   : > { %p619_p3 = scmp.lt.u32.totalorder %s883_s22, %s987_s1  ;;  %p620_p6 = scmp.lt.u32.totalorder %s618_s30, %s613_s8 }
  0x37   : > { %p616_p11 = pnand %p614_p9, %p585_p5  ;;  %p622_p10 = scmp.lt.u32.totalorder %s613_s8, %s883_s22 }
  0x38   : > { %p621_p4 = por %p620_p6, %p619_p3 }
  0x39   : > { %p617_p13 = pneg %p616_p11 }
  0x3a   : > { %p623_p12 = por %p622_p10, %p621_p4 }
  0x3c   : > { %p624_p1 = pnand %p623_p12, %p617_p13 }
  0x3e   : > { %627 = shalt.err (!%p624_p1)
}
  0x3f   : > { %s628_s28 = scalar_lea.vmem %s196_s4, 64  ;;  %s732_s29 = smov [#allocation5]  }
  0x40   : > { %p629_p2 = scmp.ne.s32.totalorder %s196_s4, %s628_s28  ;;  %s633_s19 = sshll.u32 %s732_s29, 4  ;;  %s634_s19 = int_to_ptr.vmem [resolvable:$false] %s633_s19 }
  0x41   : > { %s635_s21 = scalar_lea.vmem %s634_s19, 128  ;;  %p636_p8 = scmp.lt.s32.totalorder %s196_s4, %s634_s19 }
  0x42   : > { %p631_p9 = pnand %p629_p2, %p585_p5  ;;  %p637_p7 = scmp.lt.s32.totalorder %s635_s21, %s628_s28 }
  0x44   : > { %p632_p11 = pneg %p631_p9  ;;  %p638_p3 = por %p637_p7, %p636_p8 }
  0x46   : > { %p639_p6 = pnand %p638_p3, %p632_p11 }
  0x48   : > { %642 = shalt.err (!%p639_p6)
}
  0x49   : > { %522 = dma.hbm_to_vmem [thread:$0]  (!%p838_p0), %s883_s22, 64, %s196_s4, %s184_s6  }
  0x4a   : > { %p1000_p13 = scmp.ne.s32.totalorder %s999_s11, 0 }
  0x4b   : > { %s910_s23 = sand.u32 (!%p1000_p13), 1, %s713_s13   ;;  %p1001_p8 = scmp.ne.s32.totalorder (!%p1000_p13), %s993_s24, 0 }
  0x4c   : > { %213 = sbr.rel (%p1000_p13) target bundleno = 166 (0xa6), region = 32  ;;  %s913_s8 = sshll.u32 (!%p1000_p13), %s910_s23, 2 }
  0x4d   : > { %s216_s10 = scalar_lea.sflag (!%p1000_p13), [#allocation3], %s910_s23  ;;  %s219_s5 = scalar_lea.vmem (!%p1000_p13), [#allocation2], %s913_s8 }
  0x53   : > { %696 = dma.done.wait (%p1001_p8), %s216_s10, 64  }
  0x54   : > { %698 = vsyncadd (%p1001_p8), %s216_s10, 4294967232  ;;  %s225_s9 = scalar_lea.sflag [#allocation6], %s910_s23  ;;  %s228_s11 = scalar_lea.vmem [#allocation5], %s913_s8 }
  0x55   : > { %700 = dma.done.wait (%p1001_p8), %s225_s9, 64  }
  0x56   : > { %702 = vsyncadd (%p1001_p8), %s225_s9, 4294967232  ;;  %v293_v0 = vld [vmem:[%s228_s11] sm:$0xf]  ;;  %v272_v2 = vld [vmem:[%s219_s5] sm:$0xf]  ;;  %p262_p0 = scmp.lt.s32.totalorder %s721_s15, 1  ;;  %v313_v10 = vlaneseq }
  0x57   : > { %v294_v1 = vunpack.c.l.bf16 %v293_v0  ;;  %v273_v5 = vunpack.c.l.bf16 %v272_v2  ;;  %vm284_vm1 = vcmask 1043456   ;;  %v733_v45 = vmov 0.0   ;;  %s261_s30 = scalar_lea.vmem [#allocation7], %s913_s8  ;;  %s507_s18 = sshll.u32 %s721_s15, 6 }
  0x58   : > { %s263_s22 = scalar_select %p262_p0, %s721_s15, 1  ;;  %v314_v14 = vshrl.u32 %v313_v10, 7  ;;  %vm734_vm4 = vmmov 1   ;;  %vm353_vm6 = vcmask 1040384   ;;  %vm355_vm7 = vcmask 1041408  }
  0x59   : > { %v295_v3 = vrot.slane %v294_v1, 4  ;;  %v275_v8 = vrot.slane %v273_v5, 4  ;;  %s375_s7 = sshll.u32 %s261_s30, 4  ;;  %vm357_vm8 = vcmask 1042432   ;;  %s939_s19 = scalar_lea.hbm %s989_s3, %s507_s18  ;;  %s934_s7 = int_to_ptr.vmem [resolvable:$true] %s375_s7 }
  0x5a   : > { %s267_s6 = scalar_lea.vmem %s988_s2, %s263_s22  ;;  %v317_v18 = vsub.s32 0, %v314_v14  ;;  %s361_s21 = scalar_lea.sflag [#allocation4], %s910_s23 }
  0x5b   : > { %v296_v4 = vmax.f32 %v294_v1, %v295_v3  ;;  %v277_v12 = vsub.f32 %v273_v5, %v275_v8  ;;  %v268_v19 = vld [vmem:[%s267_s6] sm:$0x1]  ;;  %s643_s10 = scalar_lea.vmem %s934_s7, 64  ;;  %p1002_p7 = scmp.ne.s32.totalorder %s994_s25, 0 }
  0x5c   : > { %v318_v22 = vrot.slane %v268_v19, %v317_v18  ;;  %vm269_vm3 = vcmp.gt.s32.totalorder %v268_v19, 0  ;;  %p644_p5 = scmp.ne.s32.totalorder %s934_s7, %s643_s10  ;;  %s735_s15 = smov [#allocation7]  }
  0x5d   : > { %v297_v6 = vrot.slane %v296_v4, 2  ;;  %v278_v16 = vand.u32 2147483647, %v277_v12  ;;  %v280_v17 = vmul.f32 0.5, %v277_v12  ;;  %v503_v46 = vsel %vm269_vm3, 1.0, %v733_v45  ;;  %vm334_vm5 = vmxor %vm269_vm3, %vm734_vm4  ;;  %s647_s8 = sshll.u32 %s735_s15, 4  ;;  %s648_s8 = int_to_ptr.vmem [resolvable:$false] %s647_s8 }
  0x5e   : > { %vm319_vm2 = vcmp.eq.s32.totalorder %v314_v14, %v318_v22  ;;  %v505_v52 = vsel %vm334_vm5, 1.0, %v733_v45  ;;  %v351_v58 = vrot.slane %v503_v46, %v317_v18  ;;  %p645_p4 = pnand %p644_p5, %p1002_p7  ;;  %s649_s5 = scalar_lea.vmem %s648_s8, 128 }
  0x5f   : > { %v298_v7 = vmax.f32 %v296_v4, %v297_v6  ;;  %v281_v20 = vmul.f32 %v280_v17, %v277_v12  ;;  %v504_v21 = vadd.f32 -0.5, %v278_v16  ;;  %vm279_vm0 = vcmp.lt.f32.partialorder %v278_v16, 1.0  ;;  %p650_p12 = scmp.lt.s32.totalorder %s934_s7, %s648_s8  ;;  %p651_p1 = scmp.lt.s32.totalorder %s649_s5, %s643_s10 }
  0x60   : > { %v320_v27 = vsel %vm319_vm2, %v294_v1, 0.0  ;;  %p646_p10 = pneg %p645_p4 }
  0x61   : > { %v299_v9 = vrot.slane %v298_v7, 1  ;;  %v283_v23 = vsel %vm279_vm0, %v281_v20, %v504_v21  ;;  %v321_v30 = vrot.slane %v320_v27, 4  ;;  %p652_p2 = por %p651_p1, %p650_p12 }
  0x62   : > { %v285_v25 = vsel %vm284_vm1, %v283_v23, 0.0 }
  0x63   : > { %v300_v11 = vmax.f32 %v298_v7, %v299_v9  ;;  %v286_v28 = vrot.slane %v285_v25, 4  ;;  %v322_v34 = vadd.f32 %v321_v30, %v320_v27  ;;  %p653_p9 = pnand %p652_p2, %p646_p10 }
  0x65   : > { %v301_v13 = vsub.f32 %v294_v1, %v300_v11  ;;  %v287_v32 = vadd.f32 %v286_v28, %v285_v25  ;;  %v323_v38 = vrot.slane %v322_v34, 2 }
  0x67   : > { %v302_v15 = vmul.f32 1.442695, %v301_v13  ;;  %v288_v36 = vrot.slane %v287_v32, 2  ;;  %v324_v40 = vadd.f32 %v323_v38, %v322_v34 }
  0x69   : > { %579 = vpow2.f32 %v302_v15  ;;  %v289_v39 = vadd.f32 %v288_v36, %v287_v32  ;;  %v325_v42 = vrot.slane %v324_v40, 1 }
  0x6b   : > { %v290_v41 = vrot.slane %v289_v39, 1  ;;  %v326_v48 = vadd.f32 %v325_v42, %v324_v40 }
  0x6d   : > { %v291_v44 = vadd.f32 %v290_v41, %v289_v39 }
  0x6f   : > { %v292_v50 = vmul.f32 %v503_v46, %v291_v44 }
  0x71   : > { %v345_v55 = vrot.slane %v292_v50, 6 }
  0x73   : > { %v580_v24 = vpop.eup %579 }
  0x74   : > { %v304_v26 = vrot.slane %v580_v24, 4 }
  0x76   : > { %v305_v29 = vadd.f32 %v580_v24, %v304_v26 }
  0x78   : > { %v306_v31 = vrot.slane %v305_v29, 2 }
  0x7a   : > { %v307_v33 = vadd.f32 %v306_v31, %v305_v29 }
  0x7c   : > { %v308_v35 = vrot.slane %v307_v33, 1 }
  0x7e   : > { %v309_v37 = vadd.f32 %v308_v35, %v307_v33 }
  0x80   : > { %581 = vlog2.f32 %v309_v37 }
  0x8a   : > { %v582_v43 = vpop.eup %581 }
  0x8b   : > { %v311_v47 = vmul.f32 0.6931472, %v582_v43 }
  0x8d   : > { %v312_v49 = vadd.f32 %v311_v47, %v300_v11 }
  0x8f   : > { %v327_v51 = vsub.f32 %v312_v49, %v326_v48 }
  0x91   : > { %v338_v53 = vmax.f32 %v327_v51, 0.0  ;;  %v340_v54 = vmul.f32 %v503_v46, %v327_v51 }
  0x93   : > { %v339_v56 = vmul.f32 %v505_v52, %v338_v53  ;;  %v342_v57 = vrot.slane %v340_v54, 7 }
  0x95   : > { %v354_v59 = vsel %vm353_vm6, %v339_v56, %v342_v57 }
  0x96   : > { %v356_v60 = vsel %vm355_vm7, %v354_v59, %v345_v55 }
  0x97   : > { %v358_v61 = vsel %vm357_vm8, %v356_v60, %v351_v58 }
  0x98   : > { %359 = vst [vmem:[%s261_s30] sm:$0xf] %v358_v61 }
  0x99   : > { %656 = shalt.err (!%p653_p9)
}
  0x9a   : > { %s657_s23 = scalar_lea.hbm %s939_s19, 64  ;;  %s661_s22 = scalar_lea.hbm %s989_s3, 128 }
  0x9b   : > { %p658_p11 = scmp.ne.s32.totalorder %s939_s19, %s657_s23  ;;  %p662_p13 = scmp.lt.u32.totalorder %s939_s19, %s989_s3 }
  0x9c   : > { %p663_p8 = scmp.lt.u32.totalorder %s661_s22, %s657_s23  ;;  %p665_p5 = scmp.lt.u32.totalorder %s657_s23, %s939_s19 }
  0x9d   : > { %p659_p3 = pnand %p658_p11, %p1002_p7 }
  0x9e   : > { %p664_p0 = por %p663_p8, %p662_p13 }
  0x9f   : > { %p660_p6 = pneg %p659_p3 }
  0xa0   : > { %p666_p4 = por %p665_p5, %p664_p0 }
  0xa2   : > { %p667_p10 = pnand %p666_p4, %p660_p6 }
  0xa4   : > { %670 = shalt.err (!%p667_p10)
}
  0xa5   : > { %514 = dma.vmem_to_hbm [thread:$0]  (%p1002_p7), %s934_s7, 64, %s939_s19, %s361_s21  }
  0xa6 PF: > { %s387_s6 = sand.u32 1, %s709_s12   ;;  %p1003_p12 = scmp.ne.s32.totalorder %s995_s27, 0 }
  0xa7   : > { %p1004_p1 = scmp.ge.s32.totalorder %s729_s17, 2  ;;  %s388_s30 = scalar_lea.sflag [#allocation4], %s387_s6 }
  0xa9   : > { %p524_p2 = pnand %p1004_p1, %p1003_p12 }
  0xab   : > { %704 = dma.done.wait (!%p524_p2), %s388_s30, 64  }
  0xac   : > { %706 = vsyncadd (!%p524_p2), %s388_s30, 4294967232  ;;  %s22_s17 = sadd.s32 1, %s729_s17   ;;  %s1005_s12 = smov %s713_s13 }
  0xad   : > { %p19_p9 = scmp.ge.s32.totalorder %s22_s17, 4   ;;  %s1006_s13 = smov %s717_s14 }
  0xae   : > { %s1007_s14 = smov %s812_s26  ;;  %s1008_s15 = smov %s725_s16 }
  0xaf   : > { %s1009_s16 = smov %s1011_s20  ;;  %21 = sbr.rel (!%p19_p9) target bundleno = 8 (0x8), region = 93 }
  0xb6   :  { %393 = vsyncpa [#allocation3], 1 }
  0xb7   :  { %395 = vsyncpa [#allocation3 + $0x1], 1 }
  0xb8   :  { %396 = vsyncpa [#allocation6], 1 }
  0xb9   :  { %398 = vsyncpa [#allocation6 + $0x1], 1 }
  0xba   :  { %399 = vsyncpa [#allocation4], 1 }
  0xbb   :  { %401 = vsyncpa [#allocation4 + $0x1], 1 }

</bundles_post_ra>
